<compile_context>
chip_gen: v7x
topology: tpu7x:2x2x1
jax: 0.10.0
libtpu: 0.0.40
codegen_flags: <defaults>
</compile_context>

<pallas_src>
import functools

import jax
import jax.numpy as jnp
from jax.experimental import pallas as pl
from jax.experimental.pallas import tpu as pltpu


# ---------------------------------------------------------------------------
# Kernels
# ---------------------------------------------------------------------------
def _alif_kernel(x_ref, u_ref, eta_ref, par_ref,
                 spk_ref, u_out_ref, eta_out_ref, *, b0, beta):
    """One AdaptiveLIF step on a lane-dense (tb, H) tile."""
    alpha = par_ref[0:1, :]            # packed (4, H) parameter slab
    c1 = par_ref[1:2, :]               # (1 - alpha) * Rm
    rho = par_ref[2:3, :]
    c2 = par_ref[3:4, :]               # 1 - rho

    u = u_ref[...] * alpha + c1 * x_ref[...]          # neuron_charge
    vth = b0 + beta * eta_ref[...]                    # neuron_fire threshold
    spk = ((u - vth) > 0.0).astype(u.dtype)           # Heaviside forward
    u_out_ref[...] = u - spk * vth                    # spk*(eta*beta+b0) == spk*vth
    eta_out_ref[...] = rho * eta_ref[...] + c2 * spk
    spk_ref[...] = spk.astype(spk_ref.dtype)


def _alif_seq_kernel(x_ref, u0_ref, eta0_ref, par_ref,
                     spk_ref, u_ref, eta_ref, *, b0, beta):
    """T fused timesteps.

    u_ref / eta_ref are OUTPUT blocks used as time-resident accumulators:
    their block index is constant along the innermost ("arbitrary") t axis,
    so they stay in VMEM across t and are written back to HBM only when the
    batch-tile index advances.  The grid MUST stay (batch, time) with time
    innermost -- reordering it silently produces wrong final states.
    """
    t = pl.program_id(1)

    @pl.when(t == 0)
    def _():
        u_ref[...] = u0_ref[...]
        eta_ref[...] = eta0_ref[...]

    alpha = par_ref[0:1, :]
    c1 = par_ref[1:2, :]
    rho = par_ref[2:3, :]
    c2 = par_ref[3:4, :]

    u = u_ref[...] * alpha + c1 * x_ref[0]
    vth = b0 + beta * eta_ref[...]
    spk = ((u - vth) > 0.0).astype(u.dtype)
    u_ref[...] = u - spk * vth
    eta_ref[...] = rho * eta_ref[...] + c2 * spk
    spk_ref[0] = spk.astype(spk_ref.dtype)


# ---------------------------------------------------------------------------
# Helpers
# ---------------------------------------------------------------------------
def _lif_constants(tau_m, tau_adp, Rm, dt, dtype):
    """Hoist the parameter-only exp/division out of the kernel; pack to (4,H)."""
    alpha = jnp.exp(-dt / tau_m)
    rho = jnp.exp(-dt / tau_adp)
    c1 = (1.0 - alpha) * Rm
    c2 = 1.0 - rho
    return jnp.stack([alpha, c1, rho, c2]).astype(dtype)   # (4, H)


def _sublane(itemsize):
    """Sublane multiple by element width (f32: 8, bf16: 16, int8: 32)."""
    return {4: 8, 2: 16, 1: 32}.get(int(itemsize), 8)


def _vmem_capacity_bytes():
    try:
        return int(pltpu.get_tpu_info().vmem_capacity_bytes)
    except Exception:
        return 64 << 20     # conservative fallback (v7x per-TensorCore)


def _pick_tb(B, H, itemsize, n_streams, sublane):
    """Largest batch tile that (a) divides B, (b) is a multiple of the dtype
    sublane count, (c) keeps all double-buffered streams within ~3/8 of this
    generation's VMEM, and (d) leaves >= 2 programs on the parallel axis so
    v7x megacore can shard across both TensorCores."""
    budget = min(_vmem_capacity_bytes(), 128 << 20) * 3 // 8
    tile_cap = max(sublane * H * itemsize, budget // (2 * n_streams))
    max_rows = max(sublane, tile_cap // (H * itemsize))
    if B >= 2 * sublane:
        max_rows = min(max_rows, B // 2)    # >= 2 parallel programs
    for cand in range(min(B, max_rows), 0, -1):
        if B % cand == 0 and cand % sublane == 0:
            return cand
    # TODO(synk): awkward/prime B -> whole batch as one tile; the general fix
    # is a padded last tile (pl.cdiv grid + masked stores).
    return B


def _vmem_limit_bytes(tile_bytes, n_streams):
    """Explicit scoped-VMEM limit: double-buffered streams + headroom, clamped
    to a value that is valid on v5e/v6e (128 MiB) and v7x (64 MiB) alike."""
    need = 2 * n_streams * tile_bytes + (4 << 20)
    return int(min(max(need, 32 << 20), 56 << 20))


# ---------------------------------------------------------------------------
# Wrapper: single step.
# ---------------------------------------------------------------------------
def adaptive_lif_step(x, u, eta, tau_m, tau_adp, *,
                      Rm=1.0, dt=1.0, b0=0.01, beta=1.8,
                      tb=None, spike_dtype=None):
    B, H = x.shape
    spike_dtype = x.dtype if spike_dtype is None else jnp.dtype(spike_dtype)
    n_streams = 6                       # x, u, eta in  +  spk, u', eta' out
    if tb is None:
        sub = max(_sublane(x.dtype.itemsize), _sublane(jnp.dtype(spike_dtype).itemsize))
        tb = _pick_tb(B, H, x.dtype.itemsize, n_streams, sub)
    assert B % tb == 0, "batch must tile evenly"

    params = _lif_constants(tau_m, tau_adp, Rm, dt, x.dtype)
    kern = functools.partial(_alif_kernel, b0=b0, beta=beta)

    bh_spec = pl.BlockSpec((tb, H), lambda i: (i, 0))    # lane-dense: full H
    par_spec = pl.BlockSpec((4, H), lambda i: (0, 0))    # constant block, 1 DMA stream

    tile_bytes = tb * H * x.dtype.itemsize
    spk, u_new, eta_new = pl.pallas_call(
        kern,
        out_shape=(
            jax.ShapeDtypeStruct((B, H), spike_dtype),
            jax.ShapeDtypeStruct((B, H), x.dtype),
            jax.ShapeDtypeStruct((B, H), x.dtype),
        ),
        grid_spec=pltpu.PrefetchScalarGridSpec(
            num_scalar_prefetch=0,
            grid=(B // tb,),
            in_specs=[bh_spec, bh_spec, bh_spec, par_spec],
            out_specs=[bh_spec, bh_spec, bh_spec],
        ),
        input_output_aliases={1: 1, 2: 2},      # u -> u_new, eta -> eta_new in place
        compiler_params=pltpu.CompilerParams(
            dimension_semantics=("parallel",),
            vmem_limit_bytes=_vmem_limit_bytes(tile_bytes, n_streams)),
    )(x, u, eta, params)
    return spk, u_new, eta_new


# ---------------------------------------------------------------------------
# Wrapper: fused T-step sequence (u/eta never round-trip HBM between steps).
# ---------------------------------------------------------------------------
def adaptive_lif_sequence(xs, u0, eta0, tau_m, tau_adp, *,
                          Rm=1.0, dt=1.0, b0=0.01, beta=1.8,
                          tb=None, spike_dtype=None):
    T, B, H = xs.shape
    spike_dtype = xs.dtype if spike_dtype is None else jnp.dtype(spike_dtype)
    n_streams = 6                       # x, u0, eta0 in  +  spk, u_fin, eta_fin out
    if tb is None:
        sub = max(_sublane(xs.dtype.itemsize), _sublane(jnp.dtype(spike_dtype).itemsize))
        tb = _pick_tb(B, H, xs.dtype.itemsize, n_streams, sub)
    assert B % tb == 0, "batch must tile evenly"

    params = _lif_constants(tau_m, tau_adp, Rm, dt, xs.dtype)
    kern = functools.partial(_alif_seq_kernel, b0=b0, beta=beta)

    x_spec = pl.BlockSpec((1, tb, H), lambda i, t: (t, i, 0))
    st_spec = pl.BlockSpec((tb, H), lambda i, t: (i, 0))   # constant along t -> resident
    par_spec = pl.BlockSpec((4, H), lambda i, t: (0, 0))

    tile_bytes = tb * H * xs.dtype.itemsize
    spk, u_fin, eta_fin = pl.pallas_call(
        kern,
        out_shape=(
            jax.ShapeDtypeStruct((T, B, H), spike_dtype),
            jax.ShapeDtypeStruct((B, H), xs.dtype),
            jax.ShapeDtypeStruct((B, H), xs.dtype),
        ),
        grid_spec=pltpu.PrefetchScalarGridSpec(
            num_scalar_prefetch=0,
            grid=(B // tb, T),                     # time innermost; do NOT reorder
            in_specs=[x_spec, st_spec, st_spec, par_spec],
            out_specs=[x_spec, st_spec, st_spec],
        ),
        compiler_params=pltpu.CompilerParams(
            dimension_semantics=("parallel", "arbitrary"),
            vmem_limit_bytes=_vmem_limit_bytes(tile_bytes, n_streams)),
    )(xs, u0, eta0, params)
    return spk, u_fin, eta_fin


# ---------------------------------------------------------------------------
# Pure-JAX reference (mirrors the PyTorch module line-by-line).
# ---------------------------------------------------------------------------
def adaptive_lif_step_ref(x, u, eta, tau_m, tau_adp,
                          *, Rm=1.0, dt=1.0, b0=0.01, beta=1.8):
    alpha = jnp.exp(-dt / tau_m)[None, :]
    u = u * alpha + (1.0 - alpha) * Rm * x
    vth = b0 + beta * eta
    spk = ((u - vth) > 0.0).astype(u.dtype)
    u_new = u - spk * (eta * beta + b0)
    rho = jnp.exp(-dt / tau_adp)[None, :]
    eta_new = rho * eta + (1.0 - rho) * spk
    return spk, u_new, eta_new


def adaptive_lif_sequence_ref(xs, u0, eta0, tau_m, tau_adp, **kw):
    def body(carry, x):
        u, eta = carry
        spk, u, eta = adaptive_lif_step_ref(x, u, eta, tau_m, tau_adp, **kw)
        return (u, eta), spk
    (u_fin, eta_fin), spk = jax.lax.scan(body, (u0, eta0), xs)
    return spk, u_fin, eta_fin


if __name__ == "__main__":
    B, H, T = 16, 256, 4        # batch, hidden (size = [H]), timesteps
    key = jax.random.PRNGKey(0)
    k_x, k_tm, k_ta = jax.random.split(key, 3)

    # Parameter init matching nn.init.normal_(tau_m, 200, 25) / (tau_adp, 20, 5).
    tau_m = 200.0 + 25.0 * jax.random.normal(k_tm, (H,), jnp.float32)
    tau_adp = 20.0 + 5.0 * jax.random.normal(k_ta, (H,), jnp.float32)

    xs = jax.random.normal(k_x, (T, B, H), jnp.float32)
    u0 = jnp.zeros((B, H), jnp.float32)
    eta0 = jnp.zeros((B, H), jnp.float32)

    # References first (the step kernel aliases its state inputs in place).
    spk_r, u1_r, eta1_r = adaptive_lif_step_ref(xs[0], u0, eta0, tau_m, tau_adp)
    spk_sr, u_fr, eta_fr = adaptive_lif_sequence_ref(xs, u0, eta0, tau_m, tau_adp)

    # --- single step ---
    spk, u1, eta1 = adaptive_lif_step(
        xs[0], jnp.zeros((B, H), jnp.float32), jnp.zeros((B, H), jnp.float32),
        tau_m, tau_adp)
    jax.block_until_ready((spk, u1, eta1))
    assert jnp.allclose(spk, spk_r), "spike mismatch (step)"
    assert jnp.allclose(u1, u1_r, atol=1e-6), "membrane mismatch (step)"
    assert jnp.allclose(eta1, eta1_r, atol=1e-6), "adaptation mismatch (step)"

    # --- fused T-step sequence ---
    spk_s, u_f, eta_f = adaptive_lif_sequence(
        xs, jnp.zeros((B, H), jnp.float32), jnp.zeros((B, H), jnp.float32),
        tau_m, tau_adp)
    jax.block_until_ready((spk_s, u_f, eta_f))
    assert jnp.allclose(spk_s, spk_sr), "spike mismatch (sequence)"
    assert jnp.allclose(u_f, u_fr, atol=1e-5), "membrane mismatch (sequence)"
    assert jnp.allclose(eta_f, eta_fr, atol=1e-5), "adaptation mismatch (sequence)"

    print("KERNEL_OK")
</pallas_src>

<mosaic_0001>
module attributes {stable_mosaic.version = 11 : i64} {
  func.func @_alif_kernel(%arg0: i32, %arg1: memref<8x256xf32, #tpu.memory_space<vmem>>, %arg2: memref<8x256xf32, #tpu.memory_space<vmem>>, %arg3: memref<8x256xf32, #tpu.memory_space<vmem>>, %arg4: memref<4x256xf32, #tpu.memory_space<vmem>>, %arg5: memref<8x256xf32, #tpu.memory_space<vmem>>, %arg6: memref<8x256xf32, #tpu.memory_space<vmem>>, %arg7: memref<8x256xf32, #tpu.memory_space<vmem>>) attributes {dimension_semantics = [#tpu.dimension_semantics<parallel>], iteration_bounds = array<i64: 2>, scalar_prefetch = 0 : i64, scratch_operands = 0 : i64, tpu.core_type = #tpu.core_type<tc>, window_params = [{transform_indices = @transform_0, window_bounds = array<i64: 8, 256>}, {transform_indices = @transform_1, window_bounds = array<i64: 8, 256>}, {transform_indices = @transform_2, window_bounds = array<i64: 8, 256>}, {pipeline_mode = #tpu.pipeline_mode<synchronous>, transform_indices = @transform_3, window_bounds = array<i64: 4, 256>}, {transform_indices = @transform_4, window_bounds = array<i64: 8, 256>}, {transform_indices = @transform_5, window_bounds = array<i64: 8, 256>}, {transform_indices = @transform_6, window_bounds = array<i64: 8, 256>}]} {
    %c0 = arith.constant 0 : index
    %c0_0 = arith.constant 0 : index
    %0 = vector.load %arg4[%c0, %c0_0] : memref<4x256xf32, #tpu.memory_space<vmem>>, vector<1x256xf32>
    %c1 = arith.constant 1 : index
    %c0_1 = arith.constant 0 : index
    %1 = vector.load %arg4[%c1, %c0_1] : memref<4x256xf32, #tpu.memory_space<vmem>>, vector<1x256xf32>
    %c2 = arith.constant 2 : index
    %c0_2 = arith.constant 0 : index
    %2 = vector.load %arg4[%c2, %c0_2] : memref<4x256xf32, #tpu.memory_space<vmem>>, vector<1x256xf32>
    %c3 = arith.constant 3 : index
    %c0_3 = arith.constant 0 : index
    %3 = vector.load %arg4[%c3, %c0_3] : memref<4x256xf32, #tpu.memory_space<vmem>>, vector<1x256xf32>
    %c0_4 = arith.constant 0 : index
    %c0_5 = arith.constant 0 : index
    %4 = vector.load %arg2[%c0_4, %c0_5] : memref<8x256xf32, #tpu.memory_space<vmem>>, vector<8x256xf32>
    %5 = vector.broadcast %0 : vector<1x256xf32> to vector<8x256xf32>
    %6 = arith.mulf %4, %5 : vector<8x256xf32>
    %c0_6 = arith.constant 0 : index
    %c0_7 = arith.constant 0 : index
    %7 = vector.load %arg1[%c0_6, %c0_7] : memref<8x256xf32, #tpu.memory_space<vmem>>, vector<8x256xf32>
    %8 = vector.broadcast %1 : vector<1x256xf32> to vector<8x256xf32>
    %9 = arith.mulf %8, %7 : vector<8x256xf32>
    %10 = arith.addf %6, %9 : vector<8x256xf32>
    %c0_8 = arith.constant 0 : index
    %c0_9 = arith.constant 0 : index
    %11 = vector.load %arg3[%c0_8, %c0_9] : memref<8x256xf32, #tpu.memory_space<vmem>>, vector<8x256xf32>
    %cst = arith.constant 1.800000e+00 : f32
    %12 = vector.broadcast %cst : f32 to vector<8x256xf32>
    %13 = arith.mulf %12, %11 : vector<8x256xf32>
    %cst_10 = arith.constant 0.00999999977 : f32
    %14 = vector.broadcast %cst_10 : f32 to vector<8x256xf32>
    %15 = arith.addf %14, %13 : vector<8x256xf32>
    %16 = arith.subf %10, %15 : vector<8x256xf32>
    %cst_11 = arith.constant 0.000000e+00 : f32
    %17 = vector.broadcast %cst_11 : f32 to vector<8x256xf32>
    %18 = arith.cmpf ogt, %16, %17 : vector<8x256xf32>
    %19 = arith.extui %18 : vector<8x256xi1> to vector<8x256xi32>
    %20 = arith.sitofp %19 : vector<8x256xi32> to vector<8x256xf32>
    %21 = arith.mulf %20, %15 : vector<8x256xf32>
    %22 = arith.subf %10, %21 : vector<8x256xf32>
    %c0_12 = arith.constant 0 : index
    %c0_13 = arith.constant 0 : index
    %23 = vector.load %arg6[%c0_12, %c0_13] : memref<8x256xf32, #tpu.memory_space<vmem>>, vector<8x256xf32>
    tpu.vector_store %arg6[%c0_12, %c0_13], %22 {strides = array<i32>} : memref<8x256xf32, #tpu.memory_space<vmem>>, vector<8x256xf32>,
    %c0_14 = arith.constant 0 : index
    %c0_15 = arith.constant 0 : index
    %24 = vector.load %arg3[%c0_14, %c0_15] : memref<8x256xf32, #tpu.memory_space<vmem>>, vector<8x256xf32>
    %25 = vector.broadcast %2 : vector<1x256xf32> to vector<8x256xf32>
    %26 = arith.mulf %25, %24 : vector<8x256xf32>
    %27 = vector.broadcast %3 : vector<1x256xf32> to vector<8x256xf32>
    %28 = arith.mulf %27, %20 : vector<8x256xf32>
    %29 = arith.addf %26, %28 : vector<8x256xf32>
    %c0_16 = arith.constant 0 : index
    %c0_17 = arith.constant 0 : index
    %30 = vector.load %arg7[%c0_16, %c0_17] : memref<8x256xf32, #tpu.memory_space<vmem>>, vector<8x256xf32>
    tpu.vector_store %arg7[%c0_16, %c0_17], %29 {strides = array<i32>} : memref<8x256xf32, #tpu.memory_space<vmem>>, vector<8x256xf32>,
    %c0_18 = arith.constant 0 : index
    %c0_19 = arith.constant 0 : index
    %31 = vector.load %arg5[%c0_18, %c0_19] : memref<8x256xf32, #tpu.memory_space<vmem>>, vector<8x256xf32>
    tpu.vector_store %arg5[%c0_18, %c0_19], %20 {strides = array<i32>} : memref<8x256xf32, #tpu.memory_space<vmem>>, vector<8x256xf32>,
    return
  }
  func.func @transform_0(%arg0: i32) -> (i32, i32) {
    %c0_i32 = arith.constant 0 : i32
    %c0_i32_0 = arith.constant 0 : i32
    return %arg0, %c0_i32 : i32, i32
  }
  func.func @transform_1(%arg0: i32) -> (i32, i32) {
    %c0_i32 = arith.constant 0 : i32
    %c0_i32_0 = arith.constant 0 : i32
    return %arg0, %c0_i32 : i32, i32
  }
  func.func @transform_2(%arg0: i32) -> (i32, i32) {
    %c0_i32 = arith.constant 0 : i32
    %c0_i32_0 = arith.constant 0 : i32
    return %arg0, %c0_i32 : i32, i32
  }
  func.func @transform_3(%arg0: i32) -> (i32, i32) {
    %c0_i32 = arith.constant 0 : i32
    %c0_i32_0 = arith.constant 0 : i32
    %c0_i32_1 = arith.constant 0 : i32
    return %c0_i32, %c0_i32_0 : i32, i32
  }
  func.func @transform_4(%arg0: i32) -> (i32, i32) {
    %c0_i32 = arith.constant 0 : i32
    %c0_i32_0 = arith.constant 0 : i32
    return %arg0, %c0_i32 : i32, i32
  }
  func.func @transform_5(%arg0: i32) -> (i32, i32) {
    %c0_i32 = arith.constant 0 : i32
    %c0_i32_0 = arith.constant 0 : i32
    return %arg0, %c0_i32 : i32, i32
  }
  func.func @transform_6(%arg0: i32) -> (i32, i32) {
    %c0_i32 = arith.constant 0 : i32
    %c0_i32_0 = arith.constant 0 : i32
    return %arg0, %c0_i32 : i32, i32
  }
}

</mosaic_0001>

<bundles_post_ra>
// kernel: tpu_custom_call.1
= control target key start
LH: loop header
LB: loop body
LE: loop exit
PB: predicated region body
PF: predicated region fallthrough
CT: control target
= control target key end

     0   :  { %12 = vsyncpa [#allocation3], 0  ;;  %s1315_s0 = inlined_call_operand.vmem [shape: f32[16,256], index: 0, kind: input, shape index: {}]   ;;  %s1316_s1 = inlined_call_operand.hbm [shape: f32[16,256], index: 1, kind: input, shape index: {}, may-alias: {1,5}]   ;;  %s1317_s2 = inlined_call_operand.hbm [shape: f32[16,256], index: 2, kind: input, shape index: {}, may-alias: {2,6}]   ;;  %s1318_s3 = inlined_call_operand.vmem [shape: f32[4,256], index: 3, kind: input, shape index: {}]   ;;  %s1319_s4 = inlined_call_operand.hbm [shape: f32[16,256], index: 4, kind: output, shape index: {0}]   ;;  %s1320_s5 = inlined_call_operand.hbm [shape: f32[16,256], index: 5, kind: output, shape index: {1}, may-alias: {1,5}]   ;;  %s1321_s6 = inlined_call_operand.hbm [shape: f32[16,256], index: 6, kind: output, shape index: {2}, may-alias: {2,6}]  }
   0x1   :  { %14 = vsyncpa [#allocation3 + $0x1], 0 }
   0x2   :  { %15 = vsyncpa [#allocation6], 0 }
   0x3   :  { %17 = vsyncpa [#allocation6 + $0x1], 0 }
   0x4   :  { %18 = vsyncpa [#allocation4], 0 }
   0x5   :  { %20 = vsyncpa [#allocation4 + $0x1], 0 }
   0x6   :  { %21 = vsyncpa [#allocation9], 0 }
   0x7   :  { %23 = vsyncpa [#allocation9 + $0x1], 0  ;;  %s990_s21 = smov 0   ;;  %s992_s22 = smov 0  }
   0x8   :  { %s994_s23 = smov 0   ;;  %s996_s24 = smov 0  }
   0x9 LB: > { %s1011_s25 = sadd.s32 4294967295, %s947_s24   ;;  %s1322_s26 = sadd.s32 4294967294, %s947_s24   ;;  %s947_s24 = sphi %s996_s24, %s1344_s24   ;;  %s943_s23 = sphi %s994_s23, %s1343_s23   ;;  %s939_s22 = sphi %s992_s22, %s1342_s22   ;;  %s935_s21 = sphi %s990_s21, %s1341_s21  }
   0xa   : > { %s1015_s27 = sadd.s32 1, %s947_s24   ;;  %s62_s28 = sadd.s32 1, %s943_s23 }
   0xb   : > { %s59_s29 = ssub.s32 %s947_s24, %s1015_s27  ;;  %p69_p0 = scmp.ne.s32.totalorder %s943_s23, %s939_s22 }
   0xc   : > { %p60_p1 = scmp.eq.s32.totalorder %s59_s29, 0  ;;  %p70_p2 = scmp.eq.s32.totalorder %s947_s24, 0 }
   0xd   : > { %p75_p3 = scmp.ne.s32.totalorder %s939_s22, %s935_s21  ;;  %p76_p4 = scmp.eq.s32.totalorder %s1011_s25, 0 }
   0xe   : > { %s1027_s30 = scalar_select %p60_p1, %s943_s23, %s62_s28  }
   0xf   : > { %p1029_p5 = por %p70_p2, %p69_p0  ;;  %p1033_p6 = por %p76_p4, %p75_p3 }
  0x10   : > { %p146_p7 = scmp.eq.s32.totalorder %s1011_s25, 1  ;;  %p152_p8 = scmp.eq.s32.totalorder %s1322_s26, 1 }
  0x11   : > { %s1326_s8 = scalar_select %p1033_p6, 1, 0 }
  0x12   : > { %p722_p10 = scmp.lt.s32.totalorder %s947_s24, 2  ;;  %p1042_p11 = por %p146_p7, %p69_p0 }
  0x13   : > { %p1046_p12 = por %p152_p8, %p75_p3  ;;  %s1051_s11 = sand.u32 1, %s943_s23  }
  0x14   : > { %s1327_s9 = scalar_select %p1042_p11, 1, 0 }
  0x15   : > { %s1328_s10 = scalar_select %p1046_p12, 1, 0 }
  0x16   : > { %s689_s12 = sshll.u32 %s947_s24, 8  ;;  %s659_s13 = sshll.u32 %s1051_s11, 4 }
  0x17   : > { %s1060_s16 = scalar_lea.hbm %s1316_s1, %s689_s12  ;;  %s239_s17 = scalar_lea.vmem [#allocation2], %s659_s13 }
  0x18   : > { %s247_s18 = sshll.u32 %s239_s17, 4  ;;  %p1066_p13 = pnand %p722_p10, %p1029_p5  ;;  %s1070_s18 = int_to_ptr.vmem [resolvable:$true] %s247_s18 }
  0x19   : > { %s236_s20 = scalar_lea.sflag [#allocation3], %s1051_s11  ;;  %s757_s28 = scalar_lea.hbm %s1060_s16, 256 }
  0x1a   : > { %p758_p2 = scmp.ne.s32.totalorder %s1060_s16, %s757_s28  ;;  %p759_p3 = pneg %p1066_p13 }
  0x1b   : > { %s762_s14 = scalar_lea.hbm %s1316_s1, 512  ;;  %p763_p5 = scmp.lt.u32.totalorder %s1060_s16, %s1316_s1 }
  0x1c   : > { %p760_p4 = pnand %p759_p3, %p758_p2  ;;  %p764_p8 = scmp.lt.u32.totalorder %s762_s14, %s757_s28 }
  0x1d   : > { %p766_p9 = scmp.lt.u32.totalorder %s757_s28, %s1060_s16 }
  0x1e   : > { %p761_p7 = pneg %p760_p4  ;;  %p765_p10 = por %p764_p8, %p763_p5 }
  0x20   : > { %p767_p0 = por %p766_p9, %p765_p10 }
  0x22   : > { %p768_p1 = pnand %p767_p0, %p761_p7 }
  0x24   : > { %771 = shalt.err (!%p768_p1)
}
  0x25   : > { %s772_s26 = scalar_lea.vmem %s1070_s18, 256  ;;  %s949_s29 = smov [#allocation2]  }
  0x26   : > { %p773_p2 = scmp.ne.s32.totalorder %s1070_s18, %s772_s26  ;;  %s777_s7 = sshll.u32 %s949_s29, 4  ;;  %s778_s7 = int_to_ptr.vmem [resolvable:$false] %s777_s7 }
  0x27   : > { %s779_s15 = scalar_lea.vmem %s778_s7, 512  ;;  %p780_p11 = scmp.lt.s32.totalorder %s1070_s18, %s778_s7 }
  0x28   : > { %p775_p4 = pnand %p773_p2, %p759_p3  ;;  %p781_p5 = scmp.lt.s32.totalorder %s779_s15, %s772_s26 }
  0x2a   : > { %p776_p12 = pneg %p775_p4  ;;  %p782_p8 = por %p781_p5, %p780_p11 }
  0x2c   : > { %p783_p9 = pnand %p782_p8, %p776_p12 }
  0x2e   : > { %786 = shalt.err (!%p783_p9)
}
  0x2f   : > { %708 = dma.hbm_to_vmem [thread:$0]  (!%p1066_p13), %s1060_s16, 256, %s1070_s18, %s236_s20  }
  0x30   : > { %p1330_p0 = scmp.lt.s32.totalorder %s947_s24, 3  ;;  %p1331_p1 = scmp.ge.s32.totalorder %s947_s24, 1 }
  0x31   : > { %s1113_s17 = scalar_lea.hbm %s1317_s2, %s689_s12  ;;  %s258_s29 = scalar_lea.vmem [#allocation5], %s659_s13 }
  0x32   : > { %p1104_p7 = pnand %p1331_p1, %p1330_p0  ;;  %s266_s7 = sshll.u32 %s258_s29, 4  ;;  %s267_s7 = int_to_ptr.vmem [resolvable:$true] %s266_s7 }
  0x33   : > { %s255_s16 = scalar_lea.sflag [#allocation6], %s1051_s11  ;;  %s787_s18 = scalar_lea.hbm %s1113_s17, 256 }
  0x34   : > { %s1332_s28 = scalar_select %p1104_p7, 1, 0 }
  0x35   : > { %p788_p11 = scmp.ne.s32.totalorder %s1113_s17, %s787_s18  ;;  %s792_s12 = scalar_lea.hbm %s1317_s2, 512 }
  0x36   : > { %p793_p2 = scmp.lt.u32.totalorder %s1113_s17, %s1317_s2  ;;  %p794_p4 = scmp.lt.u32.totalorder %s792_s12, %s787_s18 }
  0x37   : > { %p790_p12 = pnand %p788_p11, %p759_p3  ;;  %p796_p8 = scmp.lt.u32.totalorder %s787_s18, %s1113_s17 }
  0x38   : > { %p795_p5 = por %p794_p4, %p793_p2 }
  0x39   : > { %p791_p10 = pneg %p790_p12 }
  0x3a   : > { %p797_p9 = por %p796_p8, %p795_p5 }
  0x3c   : > { %p798_p0 = pnand %p797_p9, %p791_p10 }
  0x3e   : > { %801 = shalt.err (!%p798_p0)
}
  0x3f   : > { %s802_s11 = scalar_lea.vmem %s267_s7, 256  ;;  %s950_s13 = smov [#allocation5]  }
  0x40   : > { %p803_p1 = scmp.ne.s32.totalorder %s267_s7, %s802_s11  ;;  %s807_s29 = sshll.u32 %s950_s13, 4  ;;  %s808_s29 = int_to_ptr.vmem [resolvable:$false] %s807_s29 }
  0x41   : > { %s809_s20 = scalar_lea.vmem %s808_s29, 512  ;;  %p810_p6 = scmp.lt.s32.totalorder %s267_s7, %s808_s29 }
  0x42   : > { %p805_p11 = pnand %p803_p1, %p759_p3  ;;  %p811_p7 = scmp.lt.s32.totalorder %s809_s20, %s802_s11 }
  0x44   : > { %p806_p12 = pneg %p805_p11  ;;  %p812_p2 = por %p811_p7, %p810_p6 }
  0x46   : > { %p813_p4 = pnand %p812_p2, %p806_p12 }
  0x48   : > { %816 = shalt.err (!%p813_p4)
}
  0x49   : > { %711 = dma.hbm_to_vmem [thread:$0]  (!%p1066_p13), %s1113_s17, 256, %s267_s7, %s255_s16  }
  0x4a   : > { %p1333_p10 = scmp.ne.s32.totalorder %s1332_s28, 0 }
  0x4b   : > { %s1140_s18 = sand.u32 (!%p1333_p10), 1, %s939_s22   ;;  %p1334_p6 = scmp.ne.s32.totalorder (!%p1333_p10), %s1326_s8, 0 }
  0x4c   : > { %275 = sbr.rel (%p1333_p10) target bundleno = 165 (0xa5), region = 36  ;;  %s1143_s15 = sshll.u32 (!%p1333_p10), %s1140_s18, 4 }
  0x4d   : > { %s278_s12 = scalar_lea.sflag (!%p1333_p10), [#allocation3], %s1140_s18  ;;  %s281_s26 = scalar_lea.vmem (!%p1333_p10), [#allocation2], %s1143_s15 }
  0x53   : > { %918 = dma.done.wait (%p1334_p6), %s278_s12, 256  }
  0x54   : > { %920 = vsyncadd (%p1334_p6), %s278_s12, 4294967040  ;;  %s287_s19 = scalar_lea.sflag [#allocation6], %s1140_s18  ;;  %s290_s28 = scalar_lea.vmem [#allocation5], %s1143_s15 }
  0x55   : > { %922 = dma.done.wait (%p1334_p6), %s287_s19, 256  }
  0x56   : > { %924 = vsyncadd (%p1334_p6), %s287_s19, 4294967040  ;;  %p339_p13 = scmp.lt.s32.totalorder %s1011_s25, 1  ;;  %v354_v0 = vlaneseq  ;;  %v344_v4 = vld [vmem:[%s1318_s3] ss:$4 sm:$0x3]  ;;  %v352_v14 = vld [vmem:[%s281_s26 + $0x8] sm:$0xff] }
  0x57   : > { %v673_v5 = vld [vmem:[%s1318_s3 + $0x1] ss:$4 sm:$0x3]  ;;  %v384_v16 = vld [vmem:[%s290_s28 + $0x8] sm:$0xff]  ;;  %s1181_s16 = sshll.u32 %s1011_s25, 8  ;;  %s1184_s14 = scalar_lea.vmem [#allocation8], %s1143_s15 }
  0x58   : > { %s340_s17 = scalar_select %p339_p13, %s1011_s25, 1  ;;  %v355_v1 = vshrl.u32 %v354_v0, 7  ;;  %v351_v6 = vld [vmem:[%s281_s26] sm:$0xff]  ;;  %v386_v24 = vmul.f32 1.8, %v384_v16  ;;  %v951_v35 = vmov 0.0  }
  0x59   : > { %v383_v10 = vld [vmem:[%s290_s28] sm:$0xff]  ;;  %s324_s26 = scalar_lea.vmem [#allocation7], %s1143_s15  ;;  %s1194_s20 = scalar_lea.hbm %s1319_s4, %s1181_s16 }
  0x5a   : > { %s691_s7 = sshll.u32 %s340_s17, 4  ;;  %v356_v2 = vsub.s32 0, %v355_v1  ;;  %v360_v3 = vsub.s32 1, %v355_v1  ;;  %v385_v13 = vmul.f32 1.8, %v383_v10  ;;  %s462_s28 = sshll.u32 %s324_s26, 4  ;;  %s1188_s28 = int_to_ptr.vmem [resolvable:$true] %s462_s28 }
  0x5b   : > { %s343_s11 = scalar_lea.vmem %s1315_s0, %s691_s7  ;;  %v674_v21 = vld [vmem:[%s1318_s3 + $0x2] ss:$4 sm:$0x3]  ;;  %v675_v22 = vld [vmem:[%s1318_s3 + $0x3] ss:$4 sm:$0x3] }
  0x5c   : > { %v357_v7 = vrot.slane %v344_v4, %v356_v2  ;;  %v366_v8 = vld [vmem:[%s343_s11] sm:$0xff]  ;;  %v372_v9 = vrot.slane %v673_v5, %v356_v2  ;;  %v361_v11 = vrot.slane %v344_v4, %v360_v3  ;;  %v376_v12 = vrot.slane %v673_v5, %v360_v3  ;;  %v367_v15 = vld [vmem:[%s343_s11 + $0x8] sm:$0xff]  ;;  %s476_s11 = sshll.u32 %s1184_s14, 4  ;;  %s1200_s12 = scalar_lea.vmem [#allocation10], %s1143_s15  ;;  %s1197_s11 = int_to_ptr.vmem [resolvable:$true] %s476_s11 }
  0x5d   : > { %v387_v23 = vadd.f32 0.01, %v385_v13  ;;  %v409_v27 = vrot.slane %v674_v21, %v356_v2  ;;  %v388_v28 = vadd.f32 0.01, %v386_v24  ;;  %v413_v29 = vrot.slane %v674_v21, %v360_v3  ;;  %s438_s17 = scalar_lea.sflag [#allocation4], %s1140_s18  ;;  %s817_s7 = scalar_lea.vmem %s1188_s28, 256 }
  0x5e   : > { %v364_v17 = vmul.f32 %v357_v7, %v351_v6  ;;  %v379_v18 = vmul.f32 %v372_v9, %v366_v8  ;;  %v365_v19 = vmul.f32 %v361_v11, %v352_v14  ;;  %v380_v20 = vmul.f32 %v376_v12, %v367_v15  ;;  %p818_p3 = scmp.ne.s32.totalorder %s1188_s28, %s817_s7  ;;  %p1335_p7 = scmp.ne.s32.totalorder %s1327_s9, 0 }
  0x5f   : > { %v422_v31 = vrot.slane %v675_v22, %v356_v2  ;;  %v426_v33 = vrot.slane %v675_v22, %v360_v3  ;;  %v416_v34 = vmul.f32 %v409_v27, %v383_v10  ;;  %v417_v37 = vmul.f32 %v413_v29, %v384_v16  ;;  %s952_s13 = smov [#allocation7]  }
  0x60   : > { %v1174_v25 = vadd.f32 %v379_v18, %v364_v17  ;;  %v1176_v26 = vadd.f32 %v380_v20, %v365_v19  ;;  %p819_p5 = pnand %p818_p3, %p1335_p7  ;;  %s821_s29 = sshll.u32 %s952_s13, 4  ;;  %s822_s29 = int_to_ptr.vmem [resolvable:$false] %s821_s29 }
  0x61   : > { %s823_s8 = scalar_lea.vmem %s822_s29, 512  ;;  %p824_p9 = scmp.lt.s32.totalorder %s1188_s28, %s822_s29 }
  0x62   : > { %v389_v30 = vsub.f32 %v1174_v25, %v387_v23  ;;  %v390_v32 = vsub.f32 %v1176_v26, %v388_v28  ;;  %p820_p8 = pneg %p819_p5  ;;  %p825_p0 = scmp.lt.s32.totalorder %s823_s8, %s817_s7 }
  0x64   : > { %vm391_vm0 = vcmp.gt.f32.partialorder %v389_v30, 0.0  ;;  %vm392_vm1 = vcmp.gt.f32.partialorder %v390_v32, 0.0  ;;  %p826_p1 = por %p825_p0, %p824_p9 }
  0x65   : > { %v676_v36 = vsel %vm391_vm0, 1.0, %v951_v35  ;;  %v677_v39 = vsel %vm392_vm1, 1.0, %v951_v35 }
  0x66   : > { %v397_v38 = vmul.f32 %v676_v36, %v387_v23  ;;  %v429_v40 = vmul.f32 %v676_v36, %v422_v31  ;;  %435 = vst [vmem:[%s324_s26] sm:$0xff] %v676_v36  ;;  %v398_v41 = vmul.f32 %v677_v39, %v388_v28  ;;  %v430_v42 = vmul.f32 %v677_v39, %v426_v33  ;;  %p827_p11 = pnand %p826_p1, %p820_p8 }
  0x67   : > { %436 = vst [vmem:[%s324_s26 + $0x8] sm:$0xff] %v677_v39 }
  0x68   : > { %v399_v43 = vsub.f32 %v1174_v25, %v397_v38  ;;  %v431_v44 = vadd.f32 %v429_v40, %v416_v34 }
  0x69   : > { %830 = shalt.err (!%p827_p11)
}
  0x6a   : > { %s831_s18 = scalar_lea.hbm %s1194_s20, 256  ;;  %s835_s13 = scalar_lea.hbm %s1319_s4, 512 }
  0x6b   : > { %p832_p12 = scmp.ne.s32.totalorder %s1194_s20, %s831_s18  ;;  %p836_p10 = scmp.lt.u32.totalorder %s1194_s20, %s1319_s4 }
  0x6c   : > { %p837_p6 = scmp.lt.u32.totalorder %s835_s13, %s831_s18  ;;  %p839_p3 = scmp.lt.u32.totalorder %s831_s18, %s1194_s20 }
  0x6d   : > { %p833_p2 = pnand %p832_p12, %p1335_p7 }
  0x6e   : > { %p838_p13 = por %p837_p6, %p836_p10 }
  0x6f   : > { %p834_p4 = pneg %p833_p2 }
  0x70   : > { %p840_p5 = por %p839_p3, %p838_p13 }
  0x72   : > { %p841_p8 = pnand %p840_p5, %p834_p4 }
  0x74   : > { %844 = shalt.err (!%p841_p8)
}
  0x75   : > { %699 = dma.vmem_to_hbm [thread:$0]  (%p1335_p7), %s1188_s28, 256, %s1194_s20, %s438_s17   ;;  %v400_v45 = vsub.f32 %v1176_v26, %v398_v41  ;;  %v432_v46 = vadd.f32 %v430_v42, %v417_v37  ;;  %401 = vst [vmem:[%s1184_s14] sm:$0xff] %v399_v43  ;;  %433 = vst [vmem:[%s1200_s12] sm:$0xff] %v431_v44 }
  0x76   : > { %s1231_s7 = scalar_lea.hbm %s1320_s5, %s1181_s16  ;;  %s1336_s18 = sshll.u32 %s1200_s12, 4  ;;  %s1237_s18 = int_to_ptr.vmem [resolvable:$true] %s1336_s18 }
  0x77   : > { %s1243_s13 = scalar_lea.hbm %s1321_s6, %s1181_s16  ;;  %402 = vst [vmem:[%s1184_s14 + $0x8] sm:$0xff] %v400_v45  ;;  %434 = vst [vmem:[%s1200_s12 + $0x8] sm:$0xff] %v432_v46  ;;  %s1337_s28 = sand.u32 1, %s1011_s25  }
  0x78   : > { %s1249_s20 = scalar_lea.sflag [#allocation9], %s1337_s28  ;;  %s845_s17 = scalar_lea.vmem %s1197_s11, 256 }
  0x79   : > { %p846_p9 = scmp.ne.s32.totalorder %s1197_s11, %s845_s17  ;;  %s953_s29 = smov [#allocation8]  }
  0x7a   : > { %s849_s8 = sshll.u32 %s953_s29, 4  ;;  %s850_s8 = int_to_ptr.vmem [resolvable:$false] %s849_s8 }
  0x7b   : > { %p847_p0 = pnand %p846_p9, %p1335_p7  ;;  %s851_s19 = scalar_lea.vmem %s850_s8, 512 }
  0x7c   : > { %p852_p11 = scmp.lt.s32.totalorder %s1197_s11, %s850_s8  ;;  %p853_p12 = scmp.lt.s32.totalorder %s851_s19, %s845_s17 }
  0x7d   : > { %p848_p1 = pneg %p847_p0 }
  0x7e   : > { %p854_p2 = por %p853_p12, %p852_p11 }
  0x80   : > { %p855_p4 = pnand %p854_p2, %p848_p1 }
  0x82   : > { %858 = shalt.err (!%p855_p4)
}
  0x83   : > { %s859_s25 = scalar_lea.hbm %s1231_s7, 256  ;;  %s863_s12 = scalar_lea.hbm %s1320_s5, 512 }
  0x84   : > { %p860_p10 = scmp.ne.s32.totalorder %s1231_s7, %s859_s25  ;;  %p864_p3 = scmp.lt.u32.totalorder %s1231_s7, %s1320_s5 }
  0x85   : > { %p865_p5 = scmp.lt.u32.totalorder %s863_s12, %s859_s25  ;;  %p867_p9 = scmp.lt.u32.totalorder %s859_s25, %s1231_s7 }
  0x86   : > { %p861_p6 = pnand %p860_p10, %p1335_p7 }
  0x87   : > { %p866_p8 = por %p865_p5, %p864_p3 }
  0x88   : > { %p862_p13 = pneg %p861_p6 }
  0x89   : > { %p868_p0 = por %p867_p9, %p866_p8 }
  0x8b   : > { %p869_p1 = pnand %p868_p0, %p862_p13 }
  0x8d   : > { %872 = shalt.err (!%p869_p1)
}
  0x8e   : > { %700 = dma.vmem_to_hbm [thread:$0]  (%p1335_p7), %s1197_s11, 256, %s1231_s7, %s1249_s20  }
  0x8f   : > { %s873_s28 = scalar_lea.vmem %s1237_s18, 256  ;;  %s954_s17 = smov [#allocation10]  }
  0x90   : > { %p874_p11 = scmp.ne.s32.totalorder %s1237_s18, %s873_s28  ;;  %s877_s29 = sshll.u32 %s954_s17, 4  ;;  %s878_s29 = int_to_ptr.vmem [resolvable:$false] %s877_s29 }
  0x91   : > { %s879_s8 = scalar_lea.vmem %s878_s29, 512  ;;  %p880_p4 = scmp.lt.s32.totalorder %s1237_s18, %s878_s29 }
  0x92   : > { %p875_p12 = pnand %p874_p11, %p1335_p7  ;;  %p881_p10 = scmp.lt.s32.totalorder %s879_s8, %s873_s28 }
  0x94   : > { %p876_p2 = pneg %p875_p12  ;;  %p882_p6 = por %p881_p10, %p880_p4 }
  0x96   : > { %p883_p13 = pnand %p882_p6, %p876_p2 }
  0x98   : > { %886 = shalt.err (!%p883_p13)
}
  0x99   : > { %s887_s11 = scalar_lea.hbm %s1243_s13, 256  ;;  %s891_s25 = scalar_lea.hbm %s1321_s6, 512 }
  0x9a   : > { %p888_p3 = scmp.ne.s32.totalorder %s1243_s13, %s887_s11  ;;  %p892_p9 = scmp.lt.u32.totalorder %s1243_s13, %s1321_s6 }
  0x9b   : > { %p893_p0 = scmp.lt.u32.totalorder %s891_s25, %s887_s11  ;;  %p895_p11 = scmp.lt.u32.totalorder %s887_s11, %s1243_s13 }
  0x9c   : > { %p889_p5 = pnand %p888_p3, %p1335_p7 }
  0x9d   : > { %p894_p1 = por %p893_p0, %p892_p9 }
  0x9e   : > { %p890_p8 = pneg %p889_p5 }
  0x9f   : > { %p896_p12 = por %p895_p11, %p894_p1 }
  0xa1   : > { %p897_p2 = pnand %p896_p12, %p890_p8 }
  0xa3   : > { %900 = shalt.err (!%p897_p2)
}
  0xa4   : > { %701 = dma.vmem_to_hbm [thread:$0]  (%p1335_p7), %s1237_s18, 256, %s1243_s13, %s1249_s20  }
  0xa5 PF: > { %s502_s12 = sand.u32 1, %s935_s21   ;;  %p1338_p4 = scmp.ne.s32.totalorder %s1328_s10, 0 }
  0xa6   : > { %p1339_p10 = scmp.ge.s32.totalorder %s947_s24, 2  ;;  %s503_s15 = scalar_lea.sflag [#allocation4], %s502_s12 }
  0xa8   : > { %p713_p6 = pnand %p1339_p10, %p1338_p4 }
  0xaa   : > { %926 = dma.done.wait (!%p713_p6), %s503_s15, 256  }
  0xab   : > { %928 = vsyncadd (!%p713_p6), %s503_s15, 4294967040  ;;  %s1340_s26 = sadd.s32 4294967294, %s947_s24  }
  0xac   : > { %s511_s28 = sand.u32 1, %s1340_s26  }
  0xad   : > { %s512_s17 = scalar_lea.sflag [#allocation9], %s511_s28 }
  0xae   : > { %930 = dma.done.wait (!%p713_p6), %s512_s17, 512  }
  0xaf   : > { %932 = vsyncadd (!%p713_p6), %s512_s17, 4294966784  ;;  %p26_p7 = scmp.ge.s32.totalorder %s1015_s27, 4   ;;  %s1341_s21 = smov %s939_s22 }
  0xb0   : > { %s1342_s22 = smov %s943_s23  ;;  %s1343_s23 = smov %s1027_s30 }
  0xb1   : > { %s1344_s24 = smov %s1015_s27  ;;  %28 = sbr.rel (!%p26_p7) target bundleno = 9 (0x9), region = 132 }
  0xb8   :  { %526 = vsyncpa [#allocation3], 1 }
  0xb9   :  { %528 = vsyncpa [#allocation3 + $0x1], 1 }
  0xba   :  { %529 = vsyncpa [#allocation6], 1 }
  0xbb   :  { %531 = vsyncpa [#allocation6 + $0x1], 1 }
  0xbc   :  { %532 = vsyncpa [#allocation4], 1 }
  0xbd   :  { %534 = vsyncpa [#allocation4 + $0x1], 1 }
  0xbe   :  { %535 = vsyncpa [#allocation9], 1 }
  0xbf   :  { %537 = vsyncpa [#allocation9 + $0x1], 1 }

</bundles_post_ra>
